<compile_context>
chip_gen: v7x
topology: tpu7x:2x2x1
jax: 0.10.0
libtpu: 0.0.40
codegen_flags: <defaults>
</compile_context>

<pallas_src>
import functools

import jax
import jax.numpy as jnp
from jax import lax
from jax.experimental import pallas as pl
from jax.experimental.pallas import tpu as pltpu


# ----------------------------------------------------------------------------
# M-tile selection (review: 256 on v6e/v7x, never < 128, even grid for v7x)
# ----------------------------------------------------------------------------
def _m_block(m):
    if m <= 256:
        return m                       # full dim -> exempt from (8,128) rule
    if pl.cdiv(m, 256) % 2 == 0 or pl.cdiv(m, 128) % 2 == 1:
        return 256                     # fills v6e/v7x 256-wide MXU
    return 128                         # keeps grid length even for v7x 2xTC


# ----------------------------------------------------------------------------
# Generic fused GEMM + bias (+ReLU) kernel: one per conv-as-GEMM layer.
# ----------------------------------------------------------------------------
def _gemm_bias_act_kernel(x_ref, w_ref, b_ref, o_ref, *, relu):
    # MXU matmul: bf16 inputs, f32 accumulation; VPU epilogue bias (+ReLU).
    y = jnp.dot(x_ref[...], w_ref[...], preferred_element_type=jnp.float32)
    y = y + b_ref[...]                       # (1, N) bias broadcast over rows
    if relu:
        y = jnp.maximum(y, 0.0)
    o_ref[...] = y.astype(o_ref.dtype)


def _gemm_bias_act(x, w, b, *, relu, out_dtype):
    m, k = x.shape
    _, n = w.shape
    tm = _m_block(m)
    return pl.pallas_call(
        functools.partial(_gemm_bias_act_kernel, relu=relu),
        grid=(pl.cdiv(m, tm),),
        in_specs=[pl.BlockSpec((tm, k), lambda i: (i, 0)),
                  pl.BlockSpec((k, n), lambda i: (0, 0)),    # resident weight
                  pl.BlockSpec((1, n), lambda i: (0, 0))],   # resident bias
        out_specs=pl.BlockSpec((tm, n), lambda i: (i, 0)),
        out_shape=jax.ShapeDtypeStruct((m, n), out_dtype),
        compiler_params=pltpu.CompilerParams(
            dimension_semantics=("parallel",)),
    )(x, w, b)


# ----------------------------------------------------------------------------
# Fused FC head: fc1 (+ReLU) + fc2 in a single pallas_call.
# ----------------------------------------------------------------------------
def _fc_head_kernel(x_ref, w1_ref, b1_ref, w2_ref, b2_ref, o_ref):
    h = jnp.dot(x_ref[...], w1_ref[...], preferred_element_type=jnp.float32)
    h = jnp.maximum(h + b1_ref[...], 0.0)
    h = jnp.dot(h.astype(w2_ref.dtype), w2_ref[...],
                preferred_element_type=jnp.float32)
    h = h + b2_ref[...]
    o_ref[...] = h.astype(o_ref.dtype)       # lane-dense (bb, num_points*3)


def _fc_head(x, w1, b1, w2, b2):
    bsz, k1 = x.shape
    n1 = w1.shape[1]
    n2 = w2.shape[1]
    bb = _m_block(bsz)
    return pl.pallas_call(
        _fc_head_kernel,
        grid=(pl.cdiv(bsz, bb),),
        in_specs=[pl.BlockSpec((bb, k1), lambda i: (i, 0)),
                  pl.BlockSpec((k1, n1), lambda i: (0, 0)),
                  pl.BlockSpec((1, n1), lambda i: (0, 0)),
                  pl.BlockSpec((n1, n2), lambda i: (0, 0)),
                  pl.BlockSpec((1, n2), lambda i: (0, 0))],
        out_specs=pl.BlockSpec((bb, n2), lambda i: (i, 0)),
        out_shape=jax.ShapeDtypeStruct((bsz, n2), jnp.float32),
        compiler_params=pltpu.CompilerParams(
            dimension_semantics=("parallel",)),
    )(x, w1, b1, w2, b2)


# ----------------------------------------------------------------------------
# Patch extraction (pure XLA data movement in the wrapper, between kernels)
# ----------------------------------------------------------------------------
def _im2col(x_nhwc, k=3, stride=2, pad=1):
    """Returns (B*Ho*Wo, k*k*C) patches ordered (ky, kx, ci), plus (Ho, Wo)."""
    b, h, w, c = x_nhwc.shape
    ho = (h + 2 * pad - k) // stride + 1
    wo = (w + 2 * pad - k) // stride + 1
    xp = jnp.pad(x_nhwc, ((0, 0), (pad, pad), (pad, pad), (0, 0)))
    taps = [xp[:, ky:ky + stride * (ho - 1) + 1:stride,
               kx:kx + stride * (wo - 1) + 1:stride, :]
            for ky in range(k) for kx in range(k)]
    patches = jnp.concatenate(taps, axis=-1)           # (B, Ho, Wo, k*k*C)
    return patches.reshape(b * ho * wo, k * k * c), (ho, wo)


# ----------------------------------------------------------------------------
# One-time parameter prep: real conv weights reshaped for conv-as-GEMM
# (no dense folding, no O(in_dim^2) identity), FC weights transposed to (K, N)
# ----------------------------------------------------------------------------
def prepare_params(params, compute_dtype=jnp.bfloat16):
    def conv_gemm_w(w_oihw):
        # (Cout, Cin, kh, kw) -> (kh*kw*Cin, Cout), matching _im2col tap order
        cout = w_oihw.shape[0]
        return (jnp.transpose(w_oihw, (2, 3, 1, 0))
                .reshape(-1, cout).astype(compute_dtype))

    convs = []
    for wk, bk in (("w1", "b1"), ("w2", "b2"), ("w3", "b3")):
        convs.append((conv_gemm_w(params[wk]),
                      params[bk].reshape(1, -1).astype(jnp.float32)))
    # PyTorch Linear: y = x @ W.T + b  -> pass W.T as (K, N)
    fc = (params["wfc1"].T.astype(compute_dtype),
          params["bfc1"].reshape(1, -1).astype(jnp.float32),
          params["wfc2"].T.astype(compute_dtype),
          params["bfc2"].reshape(1, -1).astype(jnp.float32))
    return {"convs": convs, "fc": fc}


def pixel2pointcloud_forward(x_nchw, prepared):
    """Forward pass: (B, C, H, W) image -> (B, num_points, 3) point cloud."""
    b = x_nchw.shape[0]
    # NHWC + bf16 in the wrapper (halves DMA bytes into the first GEMM).
    h = jnp.transpose(x_nchw, (0, 2, 3, 1)).astype(jnp.bfloat16)
    for w, bias in prepared["convs"]:
        patches, (ho, wo) = _im2col(h)
        y = _gemm_bias_act(patches, w, bias, relu=True,
                           out_dtype=jnp.bfloat16)     # true conv FLOPs/bytes
        h = y.reshape(b, ho, wo, w.shape[1])
    # Flatten exactly like x.view(B, -1) on an NCHW tensor: (C, H, W) order.
    h = jnp.transpose(h, (0, 3, 1, 2)).reshape(b, -1)
    out2d = _fc_head(h, *prepared["fc"])                # (B, num_points*3) f32
    return out2d.reshape(b, out2d.shape[1] // 3, 3)


# ----------------------------------------------------------------------------
# Reference (pure JAX, PyTorch conventions) for correctness checking
# ----------------------------------------------------------------------------
def reference_forward(x_nchw, params):
    h = x_nchw.astype(jnp.float32)
    for wkey, bkey in (("w1", "b1"), ("w2", "b2"), ("w3", "b3")):
        h = lax.conv_general_dilated(
            h, params[wkey], (2, 2), ((1, 1), (1, 1)),
            dimension_numbers=("NCHW", "OIHW", "NCHW"))
        h = jnp.maximum(h + params[bkey][None, :, None, None], 0.0)
    b = h.shape[0]
    h = h.reshape(b, -1)                                 # NCHW flatten (C,H,W)
    h = jnp.maximum(h @ params["wfc1"].T + params["bfc1"], 0.0)
    h = h @ params["wfc2"].T + params["bfc2"]
    return h.reshape(b, -1, 3)


# ----------------------------------------------------------------------------
# Parameter init (PyTorch-style shapes: OIHW conv weights, (out,in) fc weights)
# ----------------------------------------------------------------------------
def init_params(key, num_points):
    ks = jax.random.split(key, 10)

    def conv_w(k, cout, cin):
        return jax.random.normal(k, (cout, cin, 3, 3), jnp.float32) * \
            jnp.sqrt(2.0 / (cin * 9))

    def fc_w(k, nout, nin, scale):
        return jax.random.normal(k, (nout, nin), jnp.float32) * scale

    return {
        "w1": conv_w(ks[0], 16, 3),
        "b1": 0.1 * jax.random.normal(ks[1], (16,), jnp.float32),
        "w2": conv_w(ks[2], 32, 16),
        "b2": 0.1 * jax.random.normal(ks[3], (32,), jnp.float32),
        "w3": conv_w(ks[4], 64, 32),
        "b3": 0.1 * jax.random.normal(ks[5], (64,), jnp.float32),
        "wfc1": fc_w(ks[6], 128, 256, jnp.sqrt(2.0 / 256)),
        "bfc1": 0.1 * jax.random.normal(ks[7], (128,), jnp.float32),
        "wfc2": fc_w(ks[8], num_points * 3, 128, 1.0 / jnp.sqrt(128.0)),
        "bfc2": 0.1 * jax.random.normal(ks[9], (num_points * 3,), jnp.float32),
    }


# ----------------------------------------------------------------------------
if __name__ == "__main__":
    B, C, H, W = 2, 3, 16, 16
    NUM_POINTS = 256            # num_points*3 = 768 = 6*128 -> lane-aligned

    key = jax.random.PRNGKey(0)
    params = init_params(key, NUM_POINTS)
    x = jax.random.normal(jax.random.fold_in(key, 99), (B, C, H, W),
                          jnp.float32)

    # One-time parameter prep: real conv-as-GEMM weights (bf16), FC W.T.
    prepared = prepare_params(params)

    fwd = jax.jit(pixel2pointcloud_forward)
    pts = jax.block_until_ready(fwd(x, prepared))
    assert pts.shape == (B, NUM_POINTS, 3)

    # Correctness check vs. pure-JAX (f32) reference; bf16 matmul tolerance.
    ref = jax.block_until_ready(reference_forward(x, params))
    err = float(jnp.max(jnp.abs(pts - ref)))
    scale = float(jnp.max(jnp.abs(ref)))
    assert err <= 1e-2 + 5e-2 * scale, f"max abs err {err} (ref scale {scale})"

    print("KERNEL_OK")
</pallas_src>

<mosaic_0001>
module attributes {stable_mosaic.version = 11 : i64} {
  func.func @_gemm_bias_act_kernel(%arg0: i32, %arg1: memref<128x27xbf16, #tpu.memory_space<vmem>>, %arg2: memref<27x16xbf16, #tpu.memory_space<vmem>>, %arg3: memref<1x16xf32, #tpu.memory_space<vmem>>, %arg4: memref<128x16xbf16, #tpu.memory_space<vmem>>) attributes {dimension_semantics = [#tpu.dimension_semantics<parallel>], iteration_bounds = array<i64: 1>, scalar_prefetch = 0 : i64, scratch_operands = 0 : i64, tpu.core_type = #tpu.core_type<tc>, window_params = [{transform_indices = @transform_0, window_bounds = array<i64: 128, 27>}, {pipeline_mode = #tpu.pipeline_mode<synchronous>, transform_indices = @transform_1, window_bounds = array<i64: 27, 16>}, {pipeline_mode = #tpu.pipeline_mode<synchronous>, transform_indices = @transform_2, window_bounds = array<i64: 1, 16>}, {transform_indices = @transform_3, window_bounds = array<i64: 128, 16>}]} {
    %c0 = arith.constant 0 : index
    %c0_0 = arith.constant 0 : index
    %0 = vector.load %arg1[%c0, %c0_0] : memref<128x27xbf16, #tpu.memory_space<vmem>>, vector<128x27xbf16>
    %c0_1 = arith.constant 0 : index
    %c0_2 = arith.constant 0 : index
    %1 = vector.load %arg2[%c0_1, %c0_2] : memref<27x16xbf16, #tpu.memory_space<vmem>>, vector<27x16xbf16>
    %cst = arith.constant dense<0.000000e+00> : vector<128x16xf32>
    %2 = tpu.matmul %0, %1, %cst {dimension_numbers = #tpu.dot_dimension_numbers<[1], [0], [0], [1], [0, 0, 1, 1], [], []>} : vector<128x27xbf16>, vector<27x16xbf16>, vector<128x16xf32> -> vector<128x16xf32>
    %c0_3 = arith.constant 0 : index
    %c0_4 = arith.constant 0 : index
    %3 = vector.load %arg3[%c0_3, %c0_4] : memref<1x16xf32, #tpu.memory_space<vmem>>, vector<1x16xf32>
    %4 = vector.broadcast %3 : vector<1x16xf32> to vector<128x16xf32>
    %5 = arith.addf %2, %4 : vector<128x16xf32>
    %cst_5 = arith.constant 0.000000e+00 : f32
    %6 = vector.broadcast %cst_5 : f32 to vector<128x16xf32>
    %7 = arith.maximumf %5, %6 : vector<128x16xf32>
    %8 = arith.truncf %7 : vector<128x16xf32> to vector<128x16xbf16>
    %c0_6 = arith.constant 0 : index
    %c0_7 = arith.constant 0 : index
    %9 = vector.load %arg4[%c0_6, %c0_7] : memref<128x16xbf16, #tpu.memory_space<vmem>>, vector<128x16xbf16>
    tpu.vector_store %arg4[%c0_6, %c0_7], %8 {strides = array<i32>} : memref<128x16xbf16, #tpu.memory_space<vmem>>, vector<128x16xbf16>,
    return
  }
  func.func @transform_0(%arg0: i32) -> (i32, i32) {
    %c0_i32 = arith.constant 0 : i32
    %c0_i32_0 = arith.constant 0 : i32
    return %arg0, %c0_i32 : i32, i32
  }
  func.func @transform_1(%arg0: i32) -> (i32, i32) {
    %c0_i32 = arith.constant 0 : i32
    %c0_i32_0 = arith.constant 0 : i32
    %c0_i32_1 = arith.constant 0 : i32
    return %c0_i32, %c0_i32_0 : i32, i32
  }
  func.func @transform_2(%arg0: i32) -> (i32, i32) {
    %c0_i32 = arith.constant 0 : i32
    %c0_i32_0 = arith.constant 0 : i32
    %c0_i32_1 = arith.constant 0 : i32
    return %c0_i32, %c0_i32_0 : i32, i32
  }
  func.func @transform_3(%arg0: i32) -> (i32, i32) {
    %c0_i32 = arith.constant 0 : i32
    %c0_i32_0 = arith.constant 0 : i32
    return %arg0, %c0_i32 : i32, i32
  }
}

module attributes {stable_mosaic.version = 11 : i64} {
  func.func @_gemm_bias_act_kernel(%arg0: i32, %arg1: memref<32x144xbf16, #tpu.memory_space<vmem>>, %arg2: memref<144x32xbf16, #tpu.memory_space<vmem>>, %arg3: memref<1x32xf32, #tpu.memory_space<vmem>>, %arg4: memref<32x32xbf16, #tpu.memory_space<vmem>>) attributes {dimension_semantics = [#tpu.dimension_semantics<parallel>], iteration_bounds = array<i64: 1>, scalar_prefetch = 0 : i64, scratch_operands = 0 : i64, tpu.core_type = #tpu.core_type<tc>, window_params = [{transform_indices = @transform_0, window_bounds = array<i64: 32, 144>}, {pipeline_mode = #tpu.pipeline_mode<synchronous>, transform_indices = @transform_1, window_bounds = array<i64: 144, 32>}, {pipeline_mode = #tpu.pipeline_mode<synchronous>, transform_indices = @transform_2, window_bounds = array<i64: 1, 32>}, {transform_indices = @transform_3, window_bounds = array<i64: 32, 32>}]} {
    %c0 = arith.constant 0 : index
    %c0_0 = arith.constant 0 : index
    %0 = vector.load %arg1[%c0, %c0_0] : memref<32x144xbf16, #tpu.memory_space<vmem>>, vector<32x144xbf16>
    %c0_1 = arith.constant 0 : index
    %c0_2 = arith.constant 0 : index
    %1 = vector.load %arg2[%c0_1, %c0_2] : memref<144x32xbf16, #tpu.memory_space<vmem>>, vector<144x32xbf16>
    %cst = arith.constant dense<0.000000e+00> : vector<32x32xf32>
    %2 = tpu.matmul %0, %1, %cst {dimension_numbers = #tpu.dot_dimension_numbers<[1], [0], [0], [1], [0, 0, 1, 1], [], []>} : vector<32x144xbf16>, vector<144x32xbf16>, vector<32x32xf32> -> vector<32x32xf32>
    %c0_3 = arith.constant 0 : index
    %c0_4 = arith.constant 0 : index
    %3 = vector.load %arg3[%c0_3, %c0_4] : memref<1x32xf32, #tpu.memory_space<vmem>>, vector<1x32xf32>
    %4 = vector.broadcast %3 : vector<1x32xf32> to vector<32x32xf32>
    %5 = arith.addf %2, %4 : vector<32x32xf32>
    %cst_5 = arith.constant 0.000000e+00 : f32
    %6 = vector.broadcast %cst_5 : f32 to vector<32x32xf32>
    %7 = arith.maximumf %5, %6 : vector<32x32xf32>
    %8 = arith.truncf %7 : vector<32x32xf32> to vector<32x32xbf16>
    %c0_6 = arith.constant 0 : index
    %c0_7 = arith.constant 0 : index
    %9 = vector.load %arg4[%c0_6, %c0_7] : memref<32x32xbf16, #tpu.memory_space<vmem>>, vector<32x32xbf16>
    tpu.vector_store %arg4[%c0_6, %c0_7], %8 {strides = array<i32>} : memref<32x32xbf16, #tpu.memory_space<vmem>>, vector<32x32xbf16>,
    return
  }
  func.func @transform_0(%arg0: i32) -> (i32, i32) {
    %c0_i32 = arith.constant 0 : i32
    %c0_i32_0 = arith.constant 0 : i32
    return %arg0, %c0_i32 : i32, i32
  }
  func.func @transform_1(%arg0: i32) -> (i32, i32) {
    %c0_i32 = arith.constant 0 : i32
    %c0_i32_0 = arith.constant 0 : i32
    %c0_i32_1 = arith.constant 0 : i32
    return %c0_i32, %c0_i32_0 : i32, i32
  }
  func.func @transform_2(%arg0: i32) -> (i32, i32) {
    %c0_i32 = arith.constant 0 : i32
    %c0_i32_0 = arith.constant 0 : i32
    %c0_i32_1 = arith.constant 0 : i32
    return %c0_i32, %c0_i32_0 : i32, i32
  }
  func.func @transform_3(%arg0: i32) -> (i32, i32) {
    %c0_i32 = arith.constant 0 : i32
    %c0_i32_0 = arith.constant 0 : i32
    return %arg0, %c0_i32 : i32, i32
  }
}

module attributes {stable_mosaic.version = 11 : i64} {
  func.func @_gemm_bias_act_kernel(%arg0: i32, %arg1: memref<8x288xbf16, #tpu.memory_space<vmem>>, %arg2: memref<288x64xbf16, #tpu.memory_space<vmem>>, %arg3: memref<1x64xf32, #tpu.memory_space<vmem>>, %arg4: memref<8x64xbf16, #tpu.memory_space<vmem>>) attributes {dimension_semantics = [#tpu.dimension_semantics<parallel>], iteration_bounds = array<i64: 1>, scalar_prefetch = 0 : i64, scratch_operands = 0 : i64, tpu.core_type = #tpu.core_type<tc>, window_params = [{transform_indices = @transform_0, window_bounds = array<i64: 8, 288>}, {pipeline_mode = #tpu.pipeline_mode<synchronous>, transform_indices = @transform_1, window_bounds = array<i64: 288, 64>}, {pipeline_mode = #tpu.pipeline_mode<synchronous>, transform_indices = @transform_2, window_bounds = array<i64: 1, 64>}, {transform_indices = @transform_3, window_bounds = array<i64: 8, 64>}]} {
    %c0 = arith.constant 0 : index
    %c0_0 = arith.constant 0 : index
    %0 = vector.load %arg1[%c0, %c0_0] : memref<8x288xbf16, #tpu.memory_space<vmem>>, vector<8x288xbf16>
    %c0_1 = arith.constant 0 : index
    %c0_2 = arith.constant 0 : index
    %1 = vector.load %arg2[%c0_1, %c0_2] : memref<288x64xbf16, #tpu.memory_space<vmem>>, vector<288x64xbf16>
    %cst = arith.constant dense<0.000000e+00> : vector<8x64xf32>
    %2 = tpu.matmul %0, %1, %cst {dimension_numbers = #tpu.dot_dimension_numbers<[1], [0], [0], [1], [0, 0, 1, 1], [], []>} : vector<8x288xbf16>, vector<288x64xbf16>, vector<8x64xf32> -> vector<8x64xf32>
    %c0_3 = arith.constant 0 : index
    %c0_4 = arith.constant 0 : index
    %3 = vector.load %arg3[%c0_3, %c0_4] : memref<1x64xf32, #tpu.memory_space<vmem>>, vector<1x64xf32>
    %4 = vector.broadcast %3 : vector<1x64xf32> to vector<8x64xf32>
    %5 = arith.addf %2, %4 : vector<8x64xf32>
    %cst_5 = arith.constant 0.000000e+00 : f32
    %6 = vector.broadcast %cst_5 : f32 to vector<8x64xf32>
    %7 = arith.maximumf %5, %6 : vector<8x64xf32>
    %8 = arith.truncf %7 : vector<8x64xf32> to vector<8x64xbf16>
    %c0_6 = arith.constant 0 : index
    %c0_7 = arith.constant 0 : index
    %9 = vector.load %arg4[%c0_6, %c0_7] : memref<8x64xbf16, #tpu.memory_space<vmem>>, vector<8x64xbf16>
    tpu.vector_store %arg4[%c0_6, %c0_7], %8 {strides = array<i32>} : memref<8x64xbf16, #tpu.memory_space<vmem>>, vector<8x64xbf16>,
    return
  }
  func.func @transform_0(%arg0: i32) -> (i32, i32) {
    %c0_i32 = arith.constant 0 : i32
    %c0_i32_0 = arith.constant 0 : i32
    return %arg0, %c0_i32 : i32, i32
  }
  func.func @transform_1(%arg0: i32) -> (i32, i32) {
    %c0_i32 = arith.constant 0 : i32
    %c0_i32_0 = arith.constant 0 : i32
    %c0_i32_1 = arith.constant 0 : i32
    return %c0_i32, %c0_i32_0 : i32, i32
  }
  func.func @transform_2(%arg0: i32) -> (i32, i32) {
    %c0_i32 = arith.constant 0 : i32
    %c0_i32_0 = arith.constant 0 : i32
    %c0_i32_1 = arith.constant 0 : i32
    return %c0_i32, %c0_i32_0 : i32, i32
  }
  func.func @transform_3(%arg0: i32) -> (i32, i32) {
    %c0_i32 = arith.constant 0 : i32
    %c0_i32_0 = arith.constant 0 : i32
    return %arg0, %c0_i32 : i32, i32
  }
}

module attributes {stable_mosaic.version = 11 : i64} {
  func.func @_fc_head_kernel(%arg0: i32, %arg1: memref<2x256xbf16, #tpu.memory_space<vmem>>, %arg2: memref<256x128xbf16, #tpu.memory_space<vmem>>, %arg3: memref<1x128xf32, #tpu.memory_space<vmem>>, %arg4: memref<128x768xbf16, #tpu.memory_space<vmem>>, %arg5: memref<1x768xf32, #tpu.memory_space<vmem>>, %arg6: memref<2x768xf32, #tpu.memory_space<vmem>>) attributes {dimension_semantics = [#tpu.dimension_semantics<parallel>], iteration_bounds = array<i64: 1>, scalar_prefetch = 0 : i64, scratch_operands = 0 : i64, tpu.core_type = #tpu.core_type<tc>, window_params = [{transform_indices = @transform_0, window_bounds = array<i64: 2, 256>}, {pipeline_mode = #tpu.pipeline_mode<synchronous>, transform_indices = @transform_1, window_bounds = array<i64: 256, 128>}, {pipeline_mode = #tpu.pipeline_mode<synchronous>, transform_indices = @transform_2, window_bounds = array<i64: 1, 128>}, {pipeline_mode = #tpu.pipeline_mode<synchronous>, transform_indices = @transform_3, window_bounds = array<i64: 128, 768>}, {pipeline_mode = #tpu.pipeline_mode<synchronous>, transform_indices = @transform_4, window_bounds = array<i64: 1, 768>}, {transform_indices = @transform_5, window_bounds = array<i64: 2, 768>}]} {
    %c0 = arith.constant 0 : index
    %c0_0 = arith.constant 0 : index
    %0 = vector.load %arg1[%c0, %c0_0] : memref<2x256xbf16, #tpu.memory_space<vmem>>, vector<2x256xbf16>
    %c0_1 = arith.constant 0 : index
    %c0_2 = arith.constant 0 : index
    %1 = vector.load %arg2[%c0_1, %c0_2] : memref<256x128xbf16, #tpu.memory_space<vmem>>, vector<256x128xbf16>
    %cst = arith.constant dense<0.000000e+00> : vector<2x128xf32>
    %2 = tpu.matmul %0, %1, %cst {dimension_numbers = #tpu.dot_dimension_numbers<[1], [0], [0], [1], [0, 0, 1, 1], [], []>} : vector<2x256xbf16>, vector<256x128xbf16>, vector<2x128xf32> -> vector<2x128xf32>
    %c0_3 = arith.constant 0 : index
    %c0_4 = arith.constant 0 : index
    %3 = vector.load %arg3[%c0_3, %c0_4] : memref<1x128xf32, #tpu.memory_space<vmem>>, vector<1x128xf32>
    %4 = vector.broadcast %3 : vector<1x128xf32> to vector<2x128xf32>
    %5 = arith.addf %2, %4 : vector<2x128xf32>
    %cst_5 = arith.constant 0.000000e+00 : f32
    %6 = vector.broadcast %cst_5 : f32 to vector<2x128xf32>
    %7 = arith.maximumf %5, %6 : vector<2x128xf32>
    %8 = arith.truncf %7 : vector<2x128xf32> to vector<2x128xbf16>
    %c0_6 = arith.constant 0 : index
    %c0_7 = arith.constant 0 : index
    %9 = vector.load %arg4[%c0_6, %c0_7] : memref<128x768xbf16, #tpu.memory_space<vmem>>, vector<128x768xbf16>
    %cst_8 = arith.constant dense<0.000000e+00> : vector<2x768xf32>
    %10 = tpu.matmul %8, %9, %cst_8 {dimension_numbers = #tpu.dot_dimension_numbers<[1], [0], [0], [1], [0, 0, 1, 1], [], []>} : vector<2x128xbf16>, vector<128x768xbf16>, vector<2x768xf32> -> vector<2x768xf32>
    %c0_9 = arith.constant 0 : index
    %c0_10 = arith.constant 0 : index
    %11 = vector.load %arg5[%c0_9, %c0_10] : memref<1x768xf32, #tpu.memory_space<vmem>>, vector<1x768xf32>
    %12 = vector.broadcast %11 : vector<1x768xf32> to vector<2x768xf32>
    %13 = arith.addf %10, %12 : vector<2x768xf32>
    %c0_11 = arith.constant 0 : index
    %c0_12 = arith.constant 0 : index
    %14 = vector.load %arg6[%c0_11, %c0_12] : memref<2x768xf32, #tpu.memory_space<vmem>>, vector<2x768xf32>
    tpu.vector_store %arg6[%c0_11, %c0_12], %13 {strides = array<i32>} : memref<2x768xf32, #tpu.memory_space<vmem>>, vector<2x768xf32>,
    return
  }
  func.func @transform_0(%arg0: i32) -> (i32, i32) {
    %c0_i32 = arith.constant 0 : i32
    %c0_i32_0 = arith.constant 0 : i32
    return %arg0, %c0_i32 : i32, i32
  }
  func.func @transform_1(%arg0: i32) -> (i32, i32) {
    %c0_i32 = arith.constant 0 : i32
    %c0_i32_0 = arith.constant 0 : i32
    %c0_i32_1 = arith.constant 0 : i32
    return %c0_i32, %c0_i32_0 : i32, i32
  }
  func.func @transform_2(%arg0: i32) -> (i32, i32) {
    %c0_i32 = arith.constant 0 : i32
    %c0_i32_0 = arith.constant 0 : i32
    %c0_i32_1 = arith.constant 0 : i32
    return %c0_i32, %c0_i32_0 : i32, i32
  }
  func.func @transform_3(%arg0: i32) -> (i32, i32) {
    %c0_i32 = arith.constant 0 : i32
    %c0_i32_0 = arith.constant 0 : i32
    %c0_i32_1 = arith.constant 0 : i32
    return %c0_i32, %c0_i32_0 : i32, i32
  }
  func.func @transform_4(%arg0: i32) -> (i32, i32) {
    %c0_i32 = arith.constant 0 : i32
    %c0_i32_0 = arith.constant 0 : i32
    %c0_i32_1 = arith.constant 0 : i32
    return %c0_i32, %c0_i32_0 : i32, i32
  }
  func.func @transform_5(%arg0: i32) -> (i32, i32) {
    %c0_i32 = arith.constant 0 : i32
    %c0_i32_0 = arith.constant 0 : i32
    return %arg0, %c0_i32 : i32, i32
  }
}

</mosaic_0001>

<bundles_post_ra>
// kernel: pixel2pointcloud_forward.4
= control target key start
LH: loop header
LB: loop body
LE: loop exit
PB: predicated region body
PF: predicated region fallthrough
CT: control target
= control target key end

     0   :  { %vm118_vm0 = vcmask 1044480   ;;  %vm119_vm1 = vcmask 1045504   ;;  %vm93_vm2 = vcmask 220160   ;;  %v419_v1 = vmov 65535   ;;  %s545_s1 = inlined_call_operand.vmem [shape: bf16[27,16], index: 1, kind: input, shape index: {}]   ;;  %s546_s0 = inlined_call_operand.vmem [shape: bf16[128,27], index: 0, kind: input, shape index: {}]   ;;  %s547_s2 = inlined_call_operand.vmem [shape: f32[1,16], index: 2, kind: input, shape index: {}]   ;;  %s548_s3 = inlined_call_operand.vmem [shape: bf16[128,16], index: 3, kind: output, shape index: {}]  }
   0x1   :  { %v409_v0 = vld [vmem:[%s545_s1] sm:$0xff]   ;;  %v120_v2 = vsel %vm118_vm0, 4294967295, %v419_v1  ;;  %v410_v3 = vld [vmem:[%s545_s1 + $0x8] sm:$0x3f]   ;;  %v415_v10 = vld [vmem:[%s546_s0 + $0x10] sm:$0xff]   ;;  %vm302_vm3 = vcmask 125952  }
   0x2   :  { %384 = vmatprep.subr.bf16.mxu0 %v409_v0  ;;  %404 = vmatprep.subr.bf16.mxu1 %v409_v0  ;;  %v121_v4 = vsel %vm119_vm1, %v120_v2, 0  ;;  %v411_v5 = vld [vmem:[%s546_s0] sm:$0xff]   ;;  %v413_v8 = vld [vmem:[%s546_s0 + $0x8] sm:$0xff]   ;;  %v416_v11 = vld [vmem:[%s546_s0 + $0x30] sm:$0xff]  }
   0x3   :  { %385 = vmatpush3.bf16.msra.mxu0 %v409_v0  ;;  %406 = vmatpush3.bf16.msra.mxu1 %v409_v0  ;;  %v123_v6 = vand.u32 %v410_v3, %v121_v4  ;;  %v412_v7 = vld [vmem:[%s546_s0 + $0x20] sm:$0xff]   ;;  %v414_v9 = vld [vmem:[%s546_s0 + $0x28] sm:$0xff]   ;;  %v417_v12 = vld [vmem:[%s546_s0 + $0x18] sm:$0xff]  }
   0x4   :  { %388 = vmatprep.mubr.msk.bf16.mxu0 %vm93_vm2, %v411_v5  ;;  %396 = vmatprep.mubr.msk.bf16.mxu1 %vm93_vm2, %v412_v7  ;;  %v418_v13 = vld [vmem:[%s546_s0 + $0x38] sm:$0xff]   ;;  %v323_v14 = vld [vmem:[%s547_s2] ss:$0 sm:$0xff] }
   0x5   :  { %386 = vmatprep.subr.bf16.mxu0 %v123_v6  ;;  %405 = vmatprep.subr.bf16.mxu1 %v123_v6 }
   0x7   :  { %387 = vmatpush3.bf16.msra.mxu0 %v123_v6  ;;  %407 = vmatpush3.bf16.msra.mxu1 %v123_v6 }
   0xa   :  { %389 = vmatmul.mubr.msk.bf16.vlgmr.msra.gmra.mrb[0].mxu0 %vm93_vm2, %v413_v8  ;;  %397 = vmatmul.mubr.msk.bf16.vlgmr.msra.gmra.mrb[0].mxu1 %vm93_vm2, %v414_v9 }
   0xb   :  { %392 = vmatprep.mubr.msk.bf16.mxu0 %vm93_vm2, %v415_v10  ;;  %400 = vmatprep.mubr.msk.bf16.mxu1 %vm93_vm2, %v416_v11 }
  0x12   :  { %393 = vmatmul.mubr.msk.bf16.gmra.mrb[4].mxu0 %vm93_vm2, %v417_v12  ;;  %401 = vmatmul.mubr.msk.bf16.gmra.mrb[4].mxu1 %vm93_vm2, %v418_v13 }
  0xdd   :  { %v390_v15 = vpop.f32.mrb[0].mxu0  ;;  %v398_v16 = vpop.f32.mrb[0].mxu1 }
  0xde   :  { %v168_v17 = vadd.f32 %v390_v15, %v323_v14  ;;  %v200_v18 = vadd.f32 %v398_v16, %v323_v14  ;;  %v159_v19 = vpop.f32.mrb[1].mxu0  ;;  %v191_v20 = vpop.f32.mrb[1].mxu1 }
  0xdf   :  { %v160_v21 = vadd.f32 %v323_v14, %v159_v19  ;;  %v192_v22 = vadd.f32 %v323_v14, %v191_v20  ;;  %v391_v23 = vpop.f32.mrb[2].mxu0  ;;  %v399_v24 = vpop.f32.mrb[2].mxu1 }
  0xe0   :  { %v224_v25 = vmax.f32 %v168_v17, 0.0  ;;  %v232_v26 = vmax.f32 %v200_v18, 0.0  ;;  %v171_v27 = vadd.f32 %v391_v23, %v323_v14  ;;  %v203_v28 = vadd.f32 %v399_v24, %v323_v14  ;;  %v162_v29 = vpop.f32.mrb[3].mxu0  ;;  %v194_v30 = vpop.f32.mrb[3].mxu1 }
  0xe1   :  { %v222_v31 = vmax.f32 %v160_v21, 0.0  ;;  %v230_v32 = vmax.f32 %v192_v22, 0.0  ;;  %v163_v33 = vadd.f32 %v323_v14, %v162_v29  ;;  %v195_v34 = vadd.f32 %v323_v14, %v194_v30 }
  0xe2   :  { %v360_v35 = vpack.c.bf16 %v224_v25, %v224_v25  ;;  %v368_v36 = vpack.c.bf16 %v232_v26, %v232_v26  ;;  %v225_v37 = vmax.f32 %v171_v27, 0.0  ;;  %v233_v38 = vmax.f32 %v203_v28, 0.0 }
  0xe3   :  { %v358_v39 = vpack.c.bf16 %v222_v31, %v222_v31  ;;  %v366_v40 = vpack.c.bf16 %v230_v32, %v230_v32  ;;  %v223_v41 = vmax.f32 %v163_v33, 0.0  ;;  %v231_v42 = vmax.f32 %v195_v34, 0.0 }
  0xe4   :  { %305 = vst.msk [vmem:[%s548_s3 + $0x8] sm:$0xf] %vm302_vm3, %v360_v35  ;;  %313 = vst.msk [vmem:[%s548_s3 + $0x28] sm:$0xf] %vm302_vm3, %v368_v36  ;;  %v361_v43 = vpack.c.bf16 %v225_v37, %v225_v37  ;;  %v369_v44 = vpack.c.bf16 %v233_v38, %v233_v38 }
  0xe5   :  { %303 = vst.msk [vmem:[%s548_s3] sm:$0xf] %vm302_vm3, %v358_v39  ;;  %311 = vst.msk [vmem:[%s548_s3 + $0x20] sm:$0xf] %vm302_vm3, %v366_v40  ;;  %v359_v45 = vpack.c.bf16 %v223_v41, %v223_v41  ;;  %v367_v46 = vpack.c.bf16 %v231_v42, %v231_v42  ;;  %v394_v47 = vpop.f32.mrb[4].mxu0  ;;  %v402_v48 = vpop.f32.mrb[4].mxu1 }
  0xe6   :  { %306 = vst.msk [vmem:[%s548_s3 + $0xc] sm:$0xf] %vm302_vm3, %v361_v43  ;;  %314 = vst.msk [vmem:[%s548_s3 + $0x2c] sm:$0xf] %vm302_vm3, %v369_v44  ;;  %v184_v49 = vadd.f32 %v394_v47, %v323_v14  ;;  %v216_v50 = vadd.f32 %v402_v48, %v323_v14  ;;  %v175_v51 = vpop.f32.mrb[5].mxu0  ;;  %v207_v52 = vpop.f32.mrb[5].mxu1 }
  0xe7   :  { %304 = vst.msk [vmem:[%s548_s3 + $0x4] sm:$0xf] %vm302_vm3, %v359_v45  ;;  %312 = vst.msk [vmem:[%s548_s3 + $0x24] sm:$0xf] %vm302_vm3, %v367_v46  ;;  %v176_v53 = vadd.f32 %v323_v14, %v175_v51  ;;  %v208_v54 = vadd.f32 %v323_v14, %v207_v52  ;;  %v395_v55 = vpop.f32.mrb[6].mxu0  ;;  %v403_v56 = vpop.f32.mrb[6].mxu1 }
  0xe8   :  { %v228_v57 = vmax.f32 %v184_v49, 0.0  ;;  %v236_v58 = vmax.f32 %v216_v50, 0.0  ;;  %v187_v59 = vadd.f32 %v395_v55, %v323_v14  ;;  %v219_v60 = vadd.f32 %v403_v56, %v323_v14  ;;  %v178_v61 = vpop.f32.mrb[7].mxu0  ;;  %v210_v62 = vpop.f32.mrb[7].mxu1 }
  0xe9   :  { %v226_v63 = vmax.f32 %v176_v53, 0.0  ;;  %v234_v0 = vmax.f32 %v208_v54, 0.0  ;;  %v179_v1 = vadd.f32 %v323_v14, %v178_v61  ;;  %v211_v2 = vadd.f32 %v323_v14, %v210_v62 }
  0xea   :  { %v364_v3 = vpack.c.bf16 %v228_v57, %v228_v57  ;;  %v372_v4 = vpack.c.bf16 %v236_v58, %v236_v58  ;;  %v229_v5 = vmax.f32 %v187_v59, 0.0  ;;  %v237_v6 = vmax.f32 %v219_v60, 0.0 }
  0xeb   :  { %v362_v7 = vpack.c.bf16 %v226_v63, %v226_v63  ;;  %v370_v8 = vpack.c.bf16 %v234_v0, %v234_v0  ;;  %v227_v9 = vmax.f32 %v179_v1, 0.0  ;;  %v235_v10 = vmax.f32 %v211_v2, 0.0 }
  0xec   :  { %309 = vst.msk [vmem:[%s548_s3 + $0x18] sm:$0xf] %vm302_vm3, %v364_v3  ;;  %317 = vst.msk [vmem:[%s548_s3 + $0x38] sm:$0xf] %vm302_vm3, %v372_v4  ;;  %v365_v11 = vpack.c.bf16 %v229_v5, %v229_v5  ;;  %v373_v12 = vpack.c.bf16 %v237_v6, %v237_v6 }
  0xed   :  { %307 = vst.msk [vmem:[%s548_s3 + $0x10] sm:$0xf] %vm302_vm3, %v362_v7  ;;  %315 = vst.msk [vmem:[%s548_s3 + $0x30] sm:$0xf] %vm302_vm3, %v370_v8  ;;  %v363_v13 = vpack.c.bf16 %v227_v9, %v227_v9  ;;  %v371_v14 = vpack.c.bf16 %v235_v10, %v235_v10 }
  0xee   :  { %310 = vst.msk [vmem:[%s548_s3 + $0x1c] sm:$0xf] %vm302_vm3, %v365_v11  ;;  %318 = vst.msk [vmem:[%s548_s3 + $0x3c] sm:$0xf] %vm302_vm3, %v373_v12 }
  0xef   :  { %308 = vst.msk [vmem:[%s548_s3 + $0x14] sm:$0xf] %vm302_vm3, %v363_v13  ;;  %316 = vst.msk [vmem:[%s548_s3 + $0x34] sm:$0xf] %vm302_vm3, %v371_v14 }

// kernel: pixel2pointcloud_forward.5
= control target key start
LH: loop header
LB: loop body
LE: loop exit
PB: predicated region body
PF: predicated region fallthrough
CT: control target
= control target key end

     0   :  { %v259_v0 = vmov 0   ;;  %vm116_vm0 = vcmask 130048   ;;  %vm192_vm1 = vcmask 257024   ;;  %s334_s1 = inlined_call_operand.vmem [shape: bf16[144,32], index: 1, kind: input, shape index: {}]   ;;  %s335_s0 = inlined_call_operand.vmem [shape: bf16[32,144], index: 0, kind: input, shape index: {}]   ;;  %s336_s2 = inlined_call_operand.vmem [shape: f32[1,32], index: 2, kind: input, shape index: {}]   ;;  %s337_s3 = inlined_call_operand.vmem [shape: bf16[32,32], index: 3, kind: output, shape index: {}]  }
   0x1   :  { %123 = vmatprep.subr.bf16.mxu0 %v259_v0  ;;  %225 = vmatprep.subr.bf16.mxu1 %v259_v0  ;;  %v244_v1 = vld [vmem:[%s334_s1] sm:$0xff]   ;;  %v245_v2 = vld [vmem:[%s334_s1 + $0x8] sm:$0xff]   ;;  %v246_v3 = vld [vmem:[%s334_s1 + $0x10] sm:$0xff]  }
   0x2   :  { %124 = vmatpush1.bf16.msra.mxu0 %v244_v1  ;;  %234 = vmatpush1.bf16.msra.mxu1 %v244_v1  ;;  %v247_v4 = vld [vmem:[%s334_s1 + $0x18] sm:$0xff]   ;;  %v255_v5 = vld [vmem:[%s335_s0 + $0x4] ss:$8 sps:$4 sm:$0xff]   ;;  %v250_v9 = vld [vmem:[%s334_s1 + $0x30] sm:$0xff]  }
   0x3   :  { %125 = vmatprep.subr.bf16.mxu0 %v259_v0  ;;  %226 = vmatprep.subr.bf16.mxu1 %v259_v0  ;;  %v258_v6 = vld [vmem:[%s335_s0 + $0x14] ss:$8 sps:$4 sm:$0xff]   ;;  %v248_v7 = vld [vmem:[%s334_s1 + $0x20] sm:$0xff]   ;;  %v249_v8 = vld [vmem:[%s334_s1 + $0x28] sm:$0xff]  }
   0x4   :  { %215 = vmatprep.mubr.msk.bf16.mxu0 %vm116_vm0, %v255_v5  ;;  %216 = vmatprep.mubr.msk.bf16.mxu1 %vm116_vm0, %v258_v6  ;;  %v251_v10 = vld [vmem:[%s334_s1 + $0x38] sm:$0xff]   ;;  %v252_v11 = vld [vmem:[%s334_s1 + $0x40] sm:$0xff]  }
   0x5   :  { %v253_v12 = vld [vmem:[%s335_s0] ss:$8 sps:$4 sm:$0xff]   ;;  %v256_v13 = vld [vmem:[%s335_s0 + $0x10] ss:$8 sps:$4 sm:$0xff]  }
   0x6   :  { %126 = vmatpush1.bf16.msra.mxu0 %v245_v2  ;;  %235 = vmatpush1.bf16.msra.mxu1 %v245_v2  ;;  %v201_v14 = vld [vmem:[%s336_s2] ss:$0 sm:$0xff] }
   0x7   :  { %127 = vmatprep.subr.bf16.mxu0 %v259_v0  ;;  %227 = vmatprep.subr.bf16.mxu1 %v259_v0 }
   0xa   :  { %128 = vmatpush1.bf16.msra.mxu0 %v246_v3  ;;  %236 = vmatpush1.bf16.msra.mxu1 %v246_v3 }
   0xb   :  { %129 = vmatprep.subr.bf16.mxu0 %v259_v0  ;;  %228 = vmatprep.subr.bf16.mxu1 %v259_v0 }
   0xe   :  { %130 = vmatpush1.bf16.msra.mxu0 %v247_v4  ;;  %237 = vmatpush1.bf16.msra.mxu1 %v247_v4 }
   0xf   :  { %131 = vmatprep.subr.bf16.mxu0 %v259_v0  ;;  %229 = vmatprep.subr.bf16.mxu1 %v259_v0 }
  0x12   :  { %132 = vmatpush1.bf16.msra.mxu0 %v248_v7  ;;  %238 = vmatpush1.bf16.msra.mxu1 %v248_v7 }
  0x13   :  { %133 = vmatprep.subr.bf16.mxu0 %v259_v0  ;;  %230 = vmatprep.subr.bf16.mxu1 %v259_v0 }
  0x16   :  { %134 = vmatpush1.bf16.msra.mxu0 %v249_v8  ;;  %239 = vmatpush1.bf16.msra.mxu1 %v249_v8 }
  0x17   :  { %135 = vmatprep.subr.bf16.mxu0 %v259_v0  ;;  %231 = vmatprep.subr.bf16.mxu1 %v259_v0 }
  0x1a   :  { %136 = vmatpush1.bf16.msra.mxu0 %v250_v9  ;;  %240 = vmatpush1.bf16.msra.mxu1 %v250_v9 }
  0x1b   :  { %137 = vmatprep.subr.bf16.mxu0 %v259_v0  ;;  %232 = vmatprep.subr.bf16.mxu1 %v259_v0 }
  0x1e   :  { %138 = vmatpush1.bf16.msra.mxu0 %v251_v10  ;;  %241 = vmatpush1.bf16.msra.mxu1 %v251_v10 }
  0x1f   :  { %139 = vmatprep.subr.bf16.mxu0 %v259_v0  ;;  %233 = vmatprep.subr.bf16.mxu1 %v259_v0 }
  0x22   :  { %140 = vmatpush1.bf16.msra.mxu0 %v252_v11  ;;  %242 = vmatpush1.bf16.msra.mxu1 %v252_v11 }
  0x25   :  { %156 = vmatmul.mubr.bf16.vlgmr.msra.gmra.mrb[0].mxu0 %v253_v12  ;;  %164 = vmatmul.mubr.bf16.vlgmr.msra.gmra.mrb[0].mxu1 %v256_v13 }
  0xf8   :  { %v157_v15 = vpop.f32.mrb[0].mxu0  ;;  %v165_v16 = vpop.f32.mrb[0].mxu1 }
  0xf9   :  { %v158_v17 = vadd.f32 %v201_v14, %v157_v15  ;;  %v166_v18 = vadd.f32 %v201_v14, %v165_v16  ;;  %v159_v19 = vpop.f32.mrb[1].mxu0  ;;  %v167_v20 = vpop.f32.mrb[1].mxu1 }
  0xfa   :  { %v160_v21 = vpop.f32.mrb[2].mxu0  ;;  %v168_v22 = vpop.f32.mrb[2].mxu1 }
  0xfb   :  { %v172_v23 = vmax.f32 %v158_v17, 0.0  ;;  %v174_v24 = vmax.f32 %v166_v18, 0.0  ;;  %v161_v25 = vadd.f32 %v201_v14, %v160_v21  ;;  %v169_v26 = vadd.f32 %v201_v14, %v168_v22  ;;  %v162_v27 = vpop.f32.mrb[3].mxu0  ;;  %v170_v28 = vpop.f32.mrb[3].mxu1 }
  0xfd   :  { %v221_v29 = vpack.c.bf16 %v172_v23, %v172_v23  ;;  %v223_v30 = vpack.c.bf16 %v174_v24, %v174_v24  ;;  %v173_v31 = vmax.f32 %v161_v25, 0.0  ;;  %v175_v32 = vmax.f32 %v169_v26, 0.0 }
  0xff   :  { %193 = vst.msk [vmem:[%s337_s3] sm:$0xf] %vm192_vm1, %v221_v29  ;;  %195 = vst.msk [vmem:[%s337_s3 + $0x8] sm:$0xf] %vm192_vm1, %v223_v30  ;;  %v222_v33 = vpack.c.bf16 %v173_v31, %v173_v31  ;;  %v224_v34 = vpack.c.bf16 %v175_v32, %v175_v32 }
 0x101   :  { %194 = vst.msk [vmem:[%s337_s3 + $0x4] sm:$0xf] %vm192_vm1, %v222_v33  ;;  %196 = vst.msk [vmem:[%s337_s3 + $0xc] sm:$0xf] %vm192_vm1, %v224_v34 }

// kernel: pixel2pointcloud_forward.6
= control target key start
LH: loop header
LB: loop body
LE: loop exit
PB: predicated region body
PF: predicated region fallthrough
CT: control target
= control target key end

     0   :  { %v349_v1 = vmov 0.0   ;;  %vm350_vm0 = vmmov 0   ;;  %vm178_vm1 = vcmask 261120   ;;  %vm264_vm2 = vcmask 519168   ;;  %s437_s1 = inlined_call_operand.vmem [shape: bf16[288,64], index: 1, kind: input, shape index: {}]   ;;  %s438_s0 = inlined_call_operand.vmem [shape: bf16[8,288], index: 0, kind: input, shape index: {}]   ;;  %s439_s2 = inlined_call_operand.vmem [shape: f32[1,64], index: 2, kind: input, shape index: {}]   ;;  %s440_s3 = inlined_call_operand.vmem [shape: bf16[8,64], index: 3, kind: output, shape index: {}]  }
   0x1   :  { %v328_v0 = vld [vmem:[%s437_s1 + $0x40] sm:$0xff]   ;;  %318 = vmatprep.subr.bf16.mxu1 %v349_v1  ;;  %322 = vmatprep.mubr.msk.bf16.mxu1 %vm350_vm0, %v349_v1  ;;  %v330_v3 = vld [vmem:[%s437_s1 + $0x48] sm:$0xff]   ;;  %v332_v5 = vld [vmem:[%s437_s1 + $0x50] sm:$0xff]  }
   0x2   :  { %v329_v2 = vld [vmem:[%s437_s1] sm:$0xff]   ;;  %293 = vmatprep.subr.bf16.mxu0 %v328_v0  ;;  %v331_v4 = vld [vmem:[%s437_s1 + $0x8] sm:$0xff]   ;;  %v333_v6 = vld [vmem:[%s437_s1 + $0x10] sm:$0xff]  }
   0x3   :  { %294 = vmatpush3.bf16.msra.mxu0 %v329_v2  ;;  %v334_v7 = vld [vmem:[%s437_s1 + $0x58] sm:$0xff]   ;;  %v336_v9 = vld [vmem:[%s437_s1 + $0x60] sm:$0xff]   ;;  %v338_v12 = vld [vmem:[%s437_s1 + $0x68] sm:$0xff]  }
   0x4   :  { %295 = vmatprep.subr.bf16.mxu0 %v330_v3  ;;  %v335_v8 = vld [vmem:[%s437_s1 + $0x18] sm:$0xff]   ;;  %v342_v10 = vld [vmem:[%s437_s1 + $0x80] sm:$0xff]   ;;  %v348_v15 = vld [vmem:[%s437_s1 + $0x88] sm:$0xff]  }
   0x5   :  { %v337_v11 = vld [vmem:[%s437_s1 + $0x20] sm:$0xff]   ;;  %319 = vmatpush3.bf16.msra.mxu1 %v342_v10  ;;  %v339_v16 = vld [vmem:[%s437_s1 + $0x28] sm:$0xff]   ;;  %v340_v17 = vld [vmem:[%s437_s1 + $0x70] sm:$0xff]  }
   0x6   :  { %320 = vmatprep.subr.bf16.mxu1 %v349_v1  ;;  %v15_v13 = vld [vmem:[%s438_s0] sm:$0xff]  ;;  %v347_v18 = vld [vmem:[%s438_s0 + $0x8] ss:$0 sps:$4 sm:$0xff]   ;;  %v341_v19 = vld [vmem:[%s437_s1 + $0x30] sm:$0xff]  }
   0x7   :  { %296 = vmatpush3.bf16.msra.mxu0 %v331_v4  ;;  %v272_v14 = vcombine.high %v15_v13, %v15_v13  ;;  %v343_v20 = vld [vmem:[%s437_s1 + $0x78] sm:$0xff]   ;;  %v271_v22 = vcombine.low %v15_v13, %v15_v13  ;;  %v270_v29 = vld [vmem:[%s439_s2] ss:$0 sm:$0xff] }
   0x8   :  { %297 = vmatprep.subr.bf16.mxu0 %v332_v5  ;;  %v344_v21 = vld [vmem:[%s437_s1 + $0x38] sm:$0xff]  }
   0x9   :  { %214 = vmatprep.mubr.bf16.mxu0 %v272_v14  ;;  %321 = vmatpush3.bf16.msra.mxu1 %v348_v15 }
   0xb   :  { %298 = vmatpush3.bf16.msra.mxu0 %v333_v6 }
   0xc   :  { %299 = vmatprep.subr.bf16.mxu0 %v334_v7  ;;  %323 = vmatmul.mubr.msk.bf16.vlgmr.msra.gmra.mrb[0].mxu1 %vm178_vm1, %v347_v18 }
   0xf   :  { %300 = vmatpush3.bf16.msra.mxu0 %v335_v8 }
  0x10   :  { %301 = vmatprep.subr.bf16.mxu0 %v336_v9 }
  0x13   :  { %302 = vmatpush3.bf16.msra.mxu0 %v337_v11 }
  0x14   :  { %303 = vmatprep.subr.bf16.mxu0 %v338_v12 }
  0x17   :  { %304 = vmatpush3.bf16.msra.mxu0 %v339_v16 }
  0x18   :  { %305 = vmatprep.subr.bf16.mxu0 %v340_v17 }
  0x1b   :  { %306 = vmatpush3.bf16.msra.mxu0 %v341_v19 }
  0x1c   :  { %307 = vmatprep.subr.bf16.mxu0 %v343_v20 }
  0x1f   :  { %308 = vmatpush3.bf16.msra.mxu0 %v344_v21 }
  0x22   :  { %215 = vmatmul.mubr.bf16.vlgmr.msra.gmra.mrb[0].mxu0 %v271_v22 }
  0xdf   :  { %v256_v23 = vpop.f32.mrb[0].mxu1 }
  0xe0   :  { %v324_v24 = vpop.f32.mrb[1].mxu1 }
  0xe1   :  { %v259_v25 = vpop.f32.mrb[2].mxu1 }
  0xe2   :  { %v325_v26 = vpop.f32.mrb[3].mxu1 }
  0xf5   :  { %v309_v27 = vpop.f32.mrb[0].mxu0 }
  0xf6   :  { %v310_v28 = vpop.f32.mrb[1].mxu0 }
  0xf7   :  { %v311_v30 = vadd.f32 %v310_v28, %v309_v27  ;;  %v312_v31 = vpop.f32.mrb[2].mxu0 }
  0xf8   :  { %v313_v32 = vpop.f32.mrb[3].mxu0 }
  0xf9   :  { %v217_v33 = vadd.f32 %v311_v30, %v270_v29 }
  0xfb   :  { %v257_v34 = vadd.f32 %v256_v23, %v217_v33 }
  0xfd   :  { %v262_v35 = vmax.f32 %v257_v34, 0.0 }
  0xff   :  { %v263_v36 = vpack.c.bf16 %v262_v35, %v262_v35 }
 0x101   :  { %265 = vst.msk [vmem:[%s440_s3] sm:$0xf] %vm264_vm2, %v263_v36 }

// kernel: pixel2pointcloud_forward.7
= control target key start
LH: loop header
LB: loop body
LE: loop exit
PB: predicated region body
PF: predicated region fallthrough
CT: control target
= control target key end

     0   :  { %v886_v6 = vmov 1966171168   ;;  %v73_v8 = vlaneseq  ;;  %v887_v59 = vmov 0   ;;  %s1136_s1 = inlined_call_operand.vmem [shape: bf16[256,128], index: 1, kind: input, shape index: {}]   ;;  %s1137_s0 = inlined_call_operand.vmem [shape: bf16[2,256], index: 0, kind: input, shape index: {}]   ;;  %s1138_s3 = inlined_call_operand.vmem [shape: bf16[128,768], index: 3, kind: input, shape index: {}]   ;;  %s1139_s2 = inlined_call_operand.vmem [shape: f32[1,128], index: 2, kind: input, shape index: {}]   ;;  %s1140_s4 = inlined_call_operand.vmem [shape: f32[1,768], index: 4, kind: input, shape index: {}]   ;;  %s1141_s5 = inlined_call_operand.vmem [shape: f32[2,768], index: 5, kind: output, shape index: {}]  }
   0x1   :  { %v798_v0 = vld [vmem:[%s1136_s1 + $0x40] sm:$0xff]   ;;  %v800_v2 = vld [vmem:[%s1136_s1 + $0x48] sm:$0xff]   ;;  %v802_v4 = vld [vmem:[%s1136_s1 + $0x50] sm:$0xff]   ;;  %v71_v7 = vunpack.c.l.s4 %v886_v6  ;;  %576 = vmatprep.mubr.bf16.mxu1 %v887_v59 }
   0x2   :  { %v799_v1 = vld [vmem:[%s1136_s1] sm:$0xff]   ;;  %773 = vmatprep.subr.bf16.mxu0 %v798_v0  ;;  %v801_v3 = vld [vmem:[%s1136_s1 + $0x8] sm:$0xff]   ;;  %v803_v5 = vld [vmem:[%s1136_s1 + $0x10] sm:$0xff]   ;;  %v943_v12 = vshrl.u32 %v73_v8, 7 }
   0x3   :  { %774 = vmatpush3.bf16.msra.mxu0 %v799_v1  ;;  %v804_v9 = vld [vmem:[%s1136_s1 + $0x58] sm:$0xff]   ;;  %v72_v11 = vunpack.c.0.s8 %v71_v7  ;;  %v806_v13 = vld [vmem:[%s1136_s1 + $0x60] sm:$0xff]   ;;  %v808_v15 = vld [vmem:[%s1136_s1 + $0x68] sm:$0xff]  }
   0x4   :  { %775 = vmatprep.subr.bf16.mxu0 %v800_v2  ;;  %v805_v10 = vld [vmem:[%s1136_s1 + $0x18] sm:$0xff]   ;;  %v807_v14 = vld [vmem:[%s1136_s1 + $0x20] sm:$0xff]   ;;  %v809_v21 = vld [vmem:[%s1136_s1 + $0x28] sm:$0xff]  }
   0x5   :  { %v75_v16 = vsub.s32 %v72_v11, %v943_v12  ;;  %v707_v17 = vld.sshfl [vmem:[%s1137_s0] sm:$0x11 pattern:$0x75316420]  ;;  %v814_v19 = vld [vmem:[%s1138_s3 + $0x4] ss:$24 sps:$4 sm:$0xff]  }
   0x6   :  { %v69_v18 = vcombine.high %v707_v17, %v707_v17  ;;  %v816_v20 = vld [vmem:[%s1138_s3] ss:$24 sps:$4 sm:$0xff]   ;;  %v810_v22 = vld [vmem:[%s1136_s1 + $0x70] sm:$0xff]   ;;  %544 = vmatprep.subr.bf16.mxu1 %v814_v19  ;;  %v826_v27 = vld [vmem:[%s1138_s3 + $0x64] ss:$24 sps:$4 sm:$0xff]  }
   0x7   :  { %776 = vmatpush3.bf16.msra.mxu0 %v801_v3  ;;  %v820_v24 = vld [vmem:[%s1138_s3 + $0x34] ss:$24 sps:$4 sm:$0xff]   ;;  %545 = vmatpush1.bf16.msra.mxu1 %v816_v20  ;;  %v822_v25 = vld [vmem:[%s1138_s3 + $0x30] ss:$24 sps:$4 sm:$0xff]   ;;  %v812_v28 = vld [vmem:[%s1136_s1 + $0x78] sm:$0xff]   ;;  %v76_v35 = vrot.slane %v707_v17, %v75_v16 }
   0x8   :  { %777 = vmatprep.subr.bf16.mxu0 %v802_v4  ;;  %v83_v23 = vrot.slane %v69_v18, %v75_v16  ;;  %546 = vmatprep.subr.bf16.mxu1 %v820_v24  ;;  %v811_v26 = vld [vmem:[%s1136_s1 + $0x30] sm:$0xff]   ;;  %v828_v29 = vld [vmem:[%s1138_s3 + $0x60] ss:$24 sps:$4 sm:$0xff]   ;;  %v819_v32 = vld [vmem:[%s1138_s3 + $0xc] ss:$24 sps:$4 sm:$0xff]   ;;  %v280_v24 = vsub.s32 1, %v943_v12 }
   0x9   :  { %v832_v30 = vld [vmem:[%s1138_s3 + $0x94] ss:$24 sps:$4 sm:$0xff]   ;;  %v813_v31 = vld [vmem:[%s1136_s1 + $0x38] sm:$0xff]   ;;  %v834_v33 = vld [vmem:[%s1138_s3 + $0x90] ss:$24 sps:$4 sm:$0xff]  }
   0xa   :  { %214 = vmatprep.mubr.bf16.mxu0 %v83_v23  ;;  %v838_v34 = vld [vmem:[%s1138_s3 + $0xc4] ss:$24 sps:$4 sm:$0xff]   ;;  %v817_v36 = vld [vmem:[%s1138_s3 + $0x8] ss:$24 sps:$4 sm:$0xff]   ;;  %v844_v39 = vld [vmem:[%s1138_s3 + $0xf4] ss:$24 sps:$4 sm:$0xff]  }
   0xb   :  { %778 = vmatpush3.bf16.msra.mxu0 %v803_v5  ;;  %547 = vmatpush1.bf16.msra.mxu1 %v822_v25  ;;  %v825_v37 = vld [vmem:[%s1138_s3 + $0x3c] ss:$24 sps:$4 sm:$0xff]   ;;  %v840_v38 = vld [vmem:[%s1138_s3 + $0xc0] ss:$24 sps:$4 sm:$0xff]   ;;  %v831_v41 = vld [vmem:[%s1138_s3 + $0x6c] ss:$24 sps:$4 sm:$0xff]  }
   0xc   :  { %779 = vmatprep.subr.bf16.mxu0 %v804_v9  ;;  %548 = vmatprep.subr.bf16.mxu1 %v826_v27  ;;  %v823_v40 = vld [vmem:[%s1138_s3 + $0x38] ss:$24 sps:$4 sm:$0xff]   ;;  %v829_v43 = vld [vmem:[%s1138_s3 + $0x68] ss:$24 sps:$4 sm:$0xff]   ;;  %v837_v44 = vld [vmem:[%s1138_s3 + $0x9c] ss:$24 sps:$4 sm:$0xff]  }
   0xd   :  { %v846_v42 = vld [vmem:[%s1138_s3 + $0xf0] ss:$24 sps:$4 sm:$0xff]   ;;  %v843_v46 = vld [vmem:[%s1138_s3 + $0xcc] ss:$24 sps:$4 sm:$0xff]   ;;  %v849_v48 = vld [vmem:[%s1138_s3 + $0xfc] ss:$24 sps:$4 sm:$0xff]  }
   0xe   :  { %v835_v45 = vld [vmem:[%s1138_s3 + $0x98] ss:$24 sps:$4 sm:$0xff]   ;;  %v841_v47 = vld [vmem:[%s1138_s3 + $0xc8] ss:$24 sps:$4 sm:$0xff]   ;;  %v850_v50 = vld [vmem:[%s1138_s3 + $0x124] ss:$24 sps:$4 sm:$0xff]  }
   0xf   :  { %780 = vmatpush3.bf16.msra.mxu0 %v805_v10  ;;  %549 = vmatpush1.bf16.msra.mxu1 %v828_v29  ;;  %v847_v49 = vld [vmem:[%s1138_s3 + $0xf8] ss:$24 sps:$4 sm:$0xff]   ;;  %v855_v52 = vld [vmem:[%s1138_s3 + $0x12c] ss:$24 sps:$4 sm:$0xff]   ;;  %v853_v53 = vld [vmem:[%s1138_s3 + $0x128] ss:$24 sps:$4 sm:$0xff]  }
  0x10   :  { %781 = vmatprep.subr.bf16.mxu0 %v806_v13  ;;  %550 = vmatprep.subr.bf16.mxu1 %v832_v30  ;;  %v852_v51 = vld [vmem:[%s1138_s3 + $0x120] ss:$24 sps:$4 sm:$0xff]   ;;  %v856_v54 = vld [vmem:[%s1138_s3 + $0x154] ss:$24 sps:$4 sm:$0xff]   ;;  %v858_v55 = vld [vmem:[%s1138_s3 + $0x150] ss:$24 sps:$4 sm:$0xff]  }
  0x11   :  { %v861_v56 = vld [vmem:[%s1138_s3 + $0x15c] ss:$24 sps:$4 sm:$0xff]   ;;  %v859_v57 = vld [vmem:[%s1138_s3 + $0x158] ss:$24 sps:$4 sm:$0xff]   ;;  %v706_v61 = vld [vmem:[%s1139_s2] ss:$0 sm:$0xff] }
  0x12   :  { %v864_v58 = vld [vmem:[%s1138_s3 + $0x14] ss:$24 sps:$4 sm:$0xff]   ;;  %v862_v4 = vld [vmem:[%s1138_s3 + $0x10] ss:$24 sps:$4 sm:$0xff]   ;;  %v867_v6 = vld [vmem:[%s1138_s3 + $0x44] ss:$24 sps:$4 sm:$0xff]  }
  0x13   :  { %782 = vmatpush3.bf16.msra.mxu0 %v807_v14  ;;  %551 = vmatpush1.bf16.msra.mxu1 %v834_v33  ;;  %v865_v7 = vld [vmem:[%s1138_s3 + $0x40] ss:$24 sps:$4 sm:$0xff]   ;;  %v870_v8 = vld [vmem:[%s1138_s3 + $0x74] ss:$24 sps:$4 sm:$0xff]   ;;  %v868_v9 = vld [vmem:[%s1138_s3 + $0x70] ss:$24 sps:$4 sm:$0xff]  }
  0x14   :  { %783 = vmatprep.subr.bf16.mxu0 %v808_v15  ;;  %552 = vmatprep.subr.bf16.mxu1 %v838_v34  ;;  %v873_v10 = vld [vmem:[%s1138_s3 + $0xa4] ss:$24 sps:$4 sm:$0xff]   ;;  %v871_v11 = vld [vmem:[%s1138_s3 + $0xa0] ss:$24 sps:$4 sm:$0xff]   ;;  %v876_v13 = vld [vmem:[%s1138_s3 + $0xd4] ss:$24 sps:$4 sm:$0xff]  }
  0x15   :  { %v874_v14 = vld [vmem:[%s1138_s3 + $0xd0] ss:$24 sps:$4 sm:$0xff]   ;;  %v879_v15 = vld [vmem:[%s1138_s3 + $0x104] ss:$24 sps:$4 sm:$0xff]   ;;  %v877_v16 = vld [vmem:[%s1138_s3 + $0x100] ss:$24 sps:$4 sm:$0xff]  }
  0x16   :  { %v882_v17 = vld [vmem:[%s1138_s3 + $0x134] ss:$24 sps:$4 sm:$0xff]   ;;  %v880_v18 = vld [vmem:[%s1138_s3 + $0x130] ss:$24 sps:$4 sm:$0xff]   ;;  %v885_v19 = vld [vmem:[%s1138_s3 + $0x164] ss:$24 sps:$4 sm:$0xff]  }
  0x17   :  { %784 = vmatpush3.bf16.msra.mxu0 %v809_v21  ;;  %553 = vmatpush1.bf16.msra.mxu1 %v840_v38  ;;  %v883_v20 = vld [vmem:[%s1138_s3 + $0x160] ss:$24 sps:$4 sm:$0xff]   ;;  %v276_v21 = vsub.s32 0, %v943_v12  ;;  %v888_v25 = vmov 1983009808   ;;  %v288_v27 = vsub.s32 3, %v943_v12 }
  0x18   :  { %785 = vmatprep.subr.bf16.mxu0 %v810_v22  ;;  %554 = vmatprep.subr.bf16.mxu1 %v844_v39  ;;  %v284_v22 = vsub.s32 2, %v943_v12  ;;  %v272_v23 = vld [vmem:[%s1140_s4] sm:$0x3f] }
  0x19   :  { %v281_v30 = vrot.slane %v272_v23, %v280_v24 }
  0x1a   :  { %v285_v29 = vrot.slane %v272_v23, %v284_v22 }
  0x1b   :  { %786 = vmatpush3.bf16.msra.mxu0 %v811_v26  ;;  %555 = vmatpush1.bf16.msra.mxu1 %v846_v42  ;;  %v676_v26 = vunpack.c.l.s4 %v888_v25 }
  0x1c   :  { %787 = vmatprep.subr.bf16.mxu0 %v812_v28  ;;  %556 = vmatprep.subr.bf16.mxu1 %v850_v50  ;;  %v277_v28 = vrot.slane %v272_v23, %v276_v21 }
  0x1f   :  { %788 = vmatpush3.bf16.msra.mxu0 %v813_v31  ;;  %557 = vmatpush1.bf16.msra.mxu1 %v852_v51  ;;  %v677_v31 = vunpack.c.0.s8 %v676_v26  ;;  %v292_v51 = vsub.s32 4, %v943_v12 }
  0x20   :  { %585 = vmatprep.subr.bf16.mxu0 %v819_v32  ;;  %558 = vmatprep.subr.bf16.mxu1 %v856_v54  ;;  %v289_v32 = vrot.slane %v272_v23, %v288_v27 }
  0x22   :  { %215 = vmatmul.mubr.bf16.vlgmr.msra.gmra.mrb[0].mxu0 %v76_v35 }
  0x23   :  { %586 = vmatpush1.bf16.msra.mxu0 %v817_v36  ;;  %559 = vmatpush1.bf16.msra.mxu1 %v858_v55 }
  0x24   :  { %587 = vmatprep.subr.bf16.mxu0 %v825_v37  ;;  %617 = vmatprep.mubr.bf16.mxu0 %v887_v59 }
  0x25   :  { %626 = vmatprep.subr.bf16.mxu1 %v864_v58 }
  0x27   :  { %588 = vmatpush1.bf16.msra.mxu0 %v823_v40  ;;  %v680_v40 = vsub.s32 %v677_v31, %v943_v12 }
  0x28   :  { %589 = vmatprep.subr.bf16.mxu0 %v831_v41 }
  0x2b   :  { %590 = vmatpush1.bf16.msra.mxu0 %v829_v43 }
  0x2c   :  { %591 = vmatprep.subr.bf16.mxu0 %v837_v44 }
  0x2f   :  { %592 = vmatpush1.bf16.msra.mxu0 %v835_v45 }
  0x30   :  { %593 = vmatprep.subr.bf16.mxu0 %v843_v46 }
  0x33   :  { %594 = vmatpush1.bf16.msra.mxu0 %v841_v47 }
  0x34   :  { %595 = vmatprep.subr.bf16.mxu0 %v849_v48 }
  0x37   :  { %596 = vmatpush1.bf16.msra.mxu0 %v847_v49 }
  0x38   :  { %597 = vmatprep.subr.bf16.mxu0 %v855_v52  ;;  %v296_v52 = vsub.s32 5, %v943_v12 }
  0x3a   :  { %v297_v54 = vrot.slane %v272_v23, %v296_v52 }
  0x3b   :  { %598 = vmatpush1.bf16.msra.mxu0 %v853_v53  ;;  %v293_v53 = vrot.slane %v272_v23, %v292_v51 }
  0x3c   :  { %599 = vmatprep.subr.bf16.mxu0 %v861_v56 }
  0x3f   :  { %600 = vmatpush1.bf16.msra.mxu0 %v859_v57 }
  0xf5   :  { %v789_v60 = vpop.f32.mrb[0].mxu0 }
  0xf6   :  { %v790_v62 = vpop.f32.mrb[1].mxu0 }
  0xf7   :  { %v791_v63 = vadd.f32 %v790_v62, %v789_v60  ;;  %v792_v0 = vpop.f32.mrb[2].mxu0 }
  0xf8   :  { %v793_v1 = vpop.f32.mrb[3].mxu0 }
  0xf9   :  { %v217_v2 = vadd.f32 %v791_v63, %v706_v61 }
  0xfb   :  { %v222_v3 = vmax.f32 %v217_v2, 0.0 }
  0xfd   :  { %v223_v5 = vpack.c.bf16 %v222_v3, %v222_v3 }
  0xff   :  { %577 = vmatmul.mubr.bf16.vlgmr.msra.gmra.mrb[0].mxu1 %v223_v5  ;;  %618 = vmatmul.mubr.bf16.vlgmr.msra.gmra.mrb[4].mxu0 %v223_v5 }
 0x100   :  { %627 = vmatpush1.bf16.msra.mxu1 %v862_v4  ;;  %658 = vmatprep.mubr.bf16.mxu1 %v887_v59 }
 0x101   :  { %628 = vmatprep.subr.bf16.mxu1 %v867_v6 }
 0x104   :  { %629 = vmatpush1.bf16.msra.mxu1 %v865_v7 }
 0x105   :  { %630 = vmatprep.subr.bf16.mxu1 %v870_v8 }
 0x108   :  { %631 = vmatpush1.bf16.msra.mxu1 %v868_v9 }
 0x109   :  { %632 = vmatprep.subr.bf16.mxu1 %v873_v10 }
 0x10c   :  { %633 = vmatpush1.bf16.msra.mxu1 %v871_v11 }
 0x10d   :  { %634 = vmatprep.subr.bf16.mxu1 %v876_v13 }
 0x110   :  { %635 = vmatpush1.bf16.msra.mxu1 %v874_v14 }
 0x111   :  { %636 = vmatprep.subr.bf16.mxu1 %v879_v15 }
 0x114   :  { %637 = vmatpush1.bf16.msra.mxu1 %v877_v16 }
 0x115   :  { %638 = vmatprep.subr.bf16.mxu1 %v882_v17 }
 0x118   :  { %639 = vmatpush1.bf16.msra.mxu1 %v880_v18 }
 0x119   :  { %640 = vmatprep.subr.bf16.mxu1 %v885_v19 }
 0x11c   :  { %641 = vmatpush1.bf16.msra.mxu1 %v883_v20 }
 0x11f   :  { %659 = vmatmul.mubr.bf16.vlgmr.msra.gmra.mrb[4].mxu1 %v223_v5 }
 0x1d2   :  { %v578_v33 = vpop.f32.mrb[0].mxu1  ;;  %v619_v34 = vpop.f32.mrb[4].mxu0 }
 0x1d3   :  { %v579_v35 = vadd.f32 %v578_v33, %v277_v28  ;;  %v620_v36 = vadd.f32 %v619_v34, %v285_v29  ;;  %v580_v37 = vpop.f32.mrb[1].mxu1  ;;  %v621_v38 = vpop.f32.mrb[5].mxu0 }
 0x1d4   :  { %v581_v39 = vadd.f32 %v580_v37, %v281_v30  ;;  %v622_v41 = vadd.f32 %v621_v38, %v289_v32  ;;  %v582_v42 = vpop.f32.mrb[2].mxu1  ;;  %v623_v43 = vpop.f32.mrb[6].mxu0 }
 0x1d5   :  { %v583_v44 = vpop.f32.mrb[3].mxu1  ;;  %v624_v45 = vpop.f32.mrb[7].mxu0 }
 0x1d6   :  { %v673_v46 = vcombine.low %v579_v35, %v581_v39  ;;  %v674_v47 = vcombine.low %v620_v36, %v622_v41 }
 0x1d8   :  { %v681_v48 = vrot.slane %v673_v46, %v680_v40  ;;  %v688_v49 = vrot.slane %v674_v47, %v680_v40 }
 0x1da   :  { %v689_v50 = vcombine.low %v681_v48, %v688_v49 }
 0x1dc   :  { %700 = vst [vmem:[%s1141_s5] sm:$0xff] %v689_v50 }
 0x1f2   :  { %v660_v55 = vpop.f32.mrb[4].mxu1 }
 0x1f3   :  { %v661_v56 = vadd.f32 %v660_v55, %v293_v53  ;;  %v662_v57 = vpop.f32.mrb[5].mxu1 }
 0x1f4   :  { %v663_v58 = vadd.f32 %v662_v57, %v297_v54  ;;  %v664_v59 = vpop.f32.mrb[6].mxu1 }
 0x1f5   :  { %v665_v60 = vpop.f32.mrb[7].mxu1 }
 0x1f6   :  { %v690_v61 = vcombine.low %v661_v56, %v663_v58 }
 0x1f8   :  { %772 = vst.sshfl [vmem:[%s1141_s5 + $0x8] sm:$0x33 pattern:$0x76325410] %v690_v61 }

</bundles_post_ra>
